<compile_context>
chip_gen: v7x
topology: tpu7x:2x2x1
jax: 0.10.0
libtpu: 0.0.40
codegen_flags: <defaults>
</compile_context>

<pallas_src>
import jax
import jax.numpy as jnp
from jax.experimental import pallas as pl
from jax.experimental.pallas import tpu as pltpu

# ----------------------- model config (matches the PyTorch module defaults) --
HIDDEN_DIM = 256          # nn module default hidden_dim
NUM_LAYERS = 3            # Net(num_layers=3)
SEQ_LEN    = 16           # T (token 0 is the special [CLS]-like token forward drops)
HEAD_LANES = 128          # lane-dense output slab; only cols 0 (B) and 1 (E) are real


def ner_kernel(x_ref, wf_ref, bf_ref, wh_ref, bh_ref, o_ref):
    """Whole sequence in one step: (Linear+ReLU)*L feature stack, B/E heads, sigmoid.

    x_ref : [T, H]     f32   token features
    wf_ref: [L, H, H]  bf16  feature-layer weights (MXU operands)
    bf_ref: [L, 1, H]  f32   feature-layer biases
    wh_ref: [H, 128]   bf16  head weights; col 0 = entity_B, col 1 = entity_E, rest 0
    bh_ref: [1, 128]   f32   head biases (zero past col 1)
    o_ref : [T, 128]   f32   sigmoid(scores); lane-dense slab, wrapper keeps [:, :2]
    """
    x = x_ref[...].astype(jnp.float32)
    for l in range(NUM_LAYERS):                            # static unroll, L is small
        h = jnp.dot(x.astype(jnp.bfloat16), wf_ref[l],      # bf16 MXU, f32 accumulate
                    preferred_element_type=jnp.float32)
        x = jnp.maximum(h + bf_ref[l], 0.0)                 # bias/ReLU in f32 (v5e-safe)
    logits = jnp.dot(x.astype(jnp.bfloat16), wh_ref[...],
                     preferred_element_type=jnp.float32) + bh_ref[...]
    # sigmoid(z) > 0.5  <=>  z > 0, but we keep sigmoid to mirror nn.Sigmoid() exactly.
    o_ref[...] = jax.nn.sigmoid(logits)


def locate_entity_scores(features, wf_bf16, bf, wh_pad, bh_pad):
    """features: [T, H] f32 -> sigmoid(B/E scores): [T, 2] via one gridless Pallas call."""
    T, H = features.shape
    assert H == HIDDEN_DIM
    vmem = pl.BlockSpec(memory_space=pltpu.MemorySpace.VMEM)   # full array, VMEM-resident
    slab = pl.pallas_call(
        ner_kernel,
        out_shape=jax.ShapeDtypeStruct((T, HEAD_LANES), jnp.float32),
        in_specs=[vmem, vmem, vmem, vmem, vmem],
        out_specs=vmem,
    )(features, wf_bf16, bf, wh_pad, bh_pad)
    return slab[:, :2]                                      # col 0 = B score, col 1 = E score


def init_params(key, hidden_dim, num_layers):
    """Deterministic synthetic parameters (shapes implied by Features / Locate_Entity)."""
    k1, k2, k3, k4 = jax.random.split(key, 4)
    scale = 1.0 / jnp.sqrt(hidden_dim)
    wf = jax.random.normal(k1, (num_layers, hidden_dim, hidden_dim), jnp.float32) * scale
    bf = jax.random.normal(k2, (num_layers, 1, hidden_dim), jnp.float32) * 0.01
    wh = jax.random.normal(k3, (hidden_dim, 2), jnp.float32) * scale
    bh = jax.random.normal(k4, (1, 2), jnp.float32) * 0.01
    return wf, bf, wh, bh


def prepare_params(params):
    """Cast MXU operands to bf16 and lane-pad the 2-column head to 128 lanes (once)."""
    wf, bf, wh, bh = params
    H = wh.shape[0]
    wf_bf16 = wf.astype(jnp.bfloat16)
    wh_pad = jnp.zeros((H, HEAD_LANES), jnp.bfloat16).at[:, :2].set(wh.astype(jnp.bfloat16))
    bh_pad = jnp.zeros((1, HEAD_LANES), jnp.float32).at[:, :2].set(bh)
    return wf_bf16, bf, wh_pad, bh_pad


def reference_scores(features, wf_bf16, bf, wh_pad, bh_pad):
    """Pure-JAX reference of the same bf16-MXU / f32-elementwise computation."""
    x = features.astype(jnp.float32)
    for l in range(NUM_LAYERS):
        h = jnp.dot(x.astype(jnp.bfloat16), wf_bf16[l], preferred_element_type=jnp.float32)
        x = jnp.maximum(h + bf[l], 0.0)
    logits = jnp.dot(x.astype(jnp.bfloat16), wh_pad, preferred_element_type=jnp.float32) + bh_pad
    return jax.nn.sigmoid(logits)[:, :2]


def net_forward(features, prepared_params, text, alias_data):
    """Mirrors Net.forward: kernel computes scores, host Python decodes spans."""
    scores = locate_entity_scores(features, *prepared_params)   # [T, 2], already sigmoid'ed
    scores = jax.device_get(scores)                             # single host round-trip
    # entity_X_scores[:, 1:] in the reference drops the leading special token
    entity_B_scores = scores[1:, 0]
    entity_E_scores = scores[1:, 1]
    entity_predict = []
    for entity_B_idx, entity_B_score in enumerate(entity_B_scores):
        if entity_B_score > 0.5:
            for entity_E_idx, entity_E_score in enumerate(entity_E_scores[entity_B_idx:]):
                if entity_E_score > 0.5:
                    entity_idx = [entity_B_idx, entity_B_idx + entity_E_idx]
                    entity = text[entity_idx[0]:entity_idx[1] + 1]
                    if entity in alias_data:
                        entity_predict.append((entity, entity_idx[0], entity_idx[1]))
                    break
    return entity_predict


if __name__ == "__main__":
    key = jax.random.PRNGKey(0)
    k_feat, k_par = jax.random.split(key)

    # TODO(synk): text2bert (external BERT encoder) is not translatable; we feed
    # deterministic synthetic token features of shape [T, HIDDEN_DIM] instead.
    entity_features = jax.random.normal(k_feat, (SEQ_LEN, HIDDEN_DIM), jnp.float32)

    params = init_params(k_par, HIDDEN_DIM, NUM_LAYERS)
    prepared = prepare_params(params)

    text = "abcdefghijklmno"            # length SEQ_LEN - 1 (token 0 is the special token)
    alias_data = {"abc", "def", "klm", "o"}

    # Run the kernel once and block on the result.
    scores = jax.block_until_ready(locate_entity_scores(entity_features, *prepared))
    assert scores.shape == (SEQ_LEN, 2)

    # Numerics sanity check against a pure-JAX reference of the same computation.
    ref = jax.block_until_ready(reference_scores(entity_features, *prepared))
    assert jnp.allclose(scores, ref, atol=1e-2), "kernel vs reference mismatch"

    # Full forward (kernel + host span decode), mirroring Net.forward semantics.
    _ = net_forward(entity_features, prepared, text, alias_data)

    print("KERNEL_OK")
</pallas_src>

<mosaic_0001>
module attributes {stable_mosaic.version = 11 : i64} {
  func.func @ner_kernel(%arg0: memref<16x256xf32, #tpu.memory_space<vmem>>, %arg1: memref<3x256x256xbf16, #tpu.memory_space<vmem>>, %arg2: memref<3x1x256xf32, #tpu.memory_space<vmem>>, %arg3: memref<256x128xbf16, #tpu.memory_space<vmem>>, %arg4: memref<1x128xf32, #tpu.memory_space<vmem>>, %arg5: memref<16x128xf32, #tpu.memory_space<vmem>>) attributes {dimension_semantics = [], scalar_prefetch = 0 : i64, scratch_operands = 0 : i64, tpu.core_type = #tpu.core_type<tc>} {
    %c0 = arith.constant 0 : index
    %c0_0 = arith.constant 0 : index
    %0 = vector.load %arg0[%c0, %c0_0] : memref<16x256xf32, #tpu.memory_space<vmem>>, vector<16x256xf32>
    %1 = arith.truncf %0 : vector<16x256xf32> to vector<16x256xbf16>
    %c0_1 = arith.constant 0 : index
    %c0_2 = arith.constant 0 : index
    %c0_3 = arith.constant 0 : index
    %2 = vector.load %arg1[%c0_1, %c0_2, %c0_3] : memref<3x256x256xbf16, #tpu.memory_space<vmem>>, vector<1x256x256xbf16>
    %3 = vector.shape_cast %2 : vector<1x256x256xbf16> to vector<256x256xbf16>
    %cst = arith.constant dense<0.000000e+00> : vector<16x256xf32>
    %4 = tpu.matmul %1, %3, %cst {dimension_numbers = #tpu.dot_dimension_numbers<[1], [0], [0], [1], [0, 0, 1, 1], [], []>} : vector<16x256xbf16>, vector<256x256xbf16>, vector<16x256xf32> -> vector<16x256xf32>
    %c0_4 = arith.constant 0 : index
    %c0_5 = arith.constant 0 : index
    %c0_6 = arith.constant 0 : index
    %5 = vector.load %arg2[%c0_4, %c0_5, %c0_6] : memref<3x1x256xf32, #tpu.memory_space<vmem>>, vector<1x1x256xf32>
    %6 = vector.shape_cast %5 : vector<1x1x256xf32> to vector<1x256xf32>
    %7 = vector.broadcast %6 : vector<1x256xf32> to vector<16x256xf32>
    %8 = arith.addf %4, %7 : vector<16x256xf32>
    %cst_7 = arith.constant 0.000000e+00 : f32
    %9 = vector.broadcast %cst_7 : f32 to vector<16x256xf32>
    %10 = arith.maximumf %8, %9 : vector<16x256xf32>
    %11 = arith.truncf %10 : vector<16x256xf32> to vector<16x256xbf16>
    %c1 = arith.constant 1 : index
    %c0_8 = arith.constant 0 : index
    %c0_9 = arith.constant 0 : index
    %12 = vector.load %arg1[%c1, %c0_8, %c0_9] : memref<3x256x256xbf16, #tpu.memory_space<vmem>>, vector<1x256x256xbf16>
    %13 = vector.shape_cast %12 : vector<1x256x256xbf16> to vector<256x256xbf16>
    %cst_10 = arith.constant dense<0.000000e+00> : vector<16x256xf32>
    %14 = tpu.matmul %11, %13, %cst_10 {dimension_numbers = #tpu.dot_dimension_numbers<[1], [0], [0], [1], [0, 0, 1, 1], [], []>} : vector<16x256xbf16>, vector<256x256xbf16>, vector<16x256xf32> -> vector<16x256xf32>
    %c1_11 = arith.constant 1 : index
    %c0_12 = arith.constant 0 : index
    %c0_13 = arith.constant 0 : index
    %15 = vector.load %arg2[%c1_11, %c0_12, %c0_13] : memref<3x1x256xf32, #tpu.memory_space<vmem>>, vector<1x1x256xf32>
    %16 = vector.shape_cast %15 : vector<1x1x256xf32> to vector<1x256xf32>
    %17 = vector.broadcast %16 : vector<1x256xf32> to vector<16x256xf32>
    %18 = arith.addf %14, %17 : vector<16x256xf32>
    %cst_14 = arith.constant 0.000000e+00 : f32
    %19 = vector.broadcast %cst_14 : f32 to vector<16x256xf32>
    %20 = arith.maximumf %18, %19 : vector<16x256xf32>
    %21 = arith.truncf %20 : vector<16x256xf32> to vector<16x256xbf16>
    %c2 = arith.constant 2 : index
    %c0_15 = arith.constant 0 : index
    %c0_16 = arith.constant 0 : index
    %22 = vector.load %arg1[%c2, %c0_15, %c0_16] : memref<3x256x256xbf16, #tpu.memory_space<vmem>>, vector<1x256x256xbf16>
    %23 = vector.shape_cast %22 : vector<1x256x256xbf16> to vector<256x256xbf16>
    %cst_17 = arith.constant dense<0.000000e+00> : vector<16x256xf32>
    %24 = tpu.matmul %21, %23, %cst_17 {dimension_numbers = #tpu.dot_dimension_numbers<[1], [0], [0], [1], [0, 0, 1, 1], [], []>} : vector<16x256xbf16>, vector<256x256xbf16>, vector<16x256xf32> -> vector<16x256xf32>
    %c2_18 = arith.constant 2 : index
    %c0_19 = arith.constant 0 : index
    %c0_20 = arith.constant 0 : index
    %25 = vector.load %arg2[%c2_18, %c0_19, %c0_20] : memref<3x1x256xf32, #tpu.memory_space<vmem>>, vector<1x1x256xf32>
    %26 = vector.shape_cast %25 : vector<1x1x256xf32> to vector<1x256xf32>
    %27 = vector.broadcast %26 : vector<1x256xf32> to vector<16x256xf32>
    %28 = arith.addf %24, %27 : vector<16x256xf32>
    %cst_21 = arith.constant 0.000000e+00 : f32
    %29 = vector.broadcast %cst_21 : f32 to vector<16x256xf32>
    %30 = arith.maximumf %28, %29 : vector<16x256xf32>
    %31 = arith.truncf %30 : vector<16x256xf32> to vector<16x256xbf16>
    %c0_22 = arith.constant 0 : index
    %c0_23 = arith.constant 0 : index
    %32 = vector.load %arg3[%c0_22, %c0_23] : memref<256x128xbf16, #tpu.memory_space<vmem>>, vector<256x128xbf16>
    %cst_24 = arith.constant dense<0.000000e+00> : vector<16x128xf32>
    %33 = tpu.matmul %31, %32, %cst_24 {dimension_numbers = #tpu.dot_dimension_numbers<[1], [0], [0], [1], [0, 0, 1, 1], [], []>} : vector<16x256xbf16>, vector<256x128xbf16>, vector<16x128xf32> -> vector<16x128xf32>
    %c0_25 = arith.constant 0 : index
    %c0_26 = arith.constant 0 : index
    %34 = vector.load %arg4[%c0_25, %c0_26] : memref<1x128xf32, #tpu.memory_space<vmem>>, vector<1x128xf32>
    %35 = vector.broadcast %34 : vector<1x128xf32> to vector<16x128xf32>
    %36 = arith.addf %33, %35 : vector<16x128xf32>
    %37 = arith.negf %36 : vector<16x128xf32>
    %38 = math.exp %37 : vector<16x128xf32>
    %cst_27 = arith.constant 1.000000e+00 : f32
    %39 = vector.broadcast %cst_27 : f32 to vector<16x128xf32>
    %40 = arith.addf %39, %38 : vector<16x128xf32>
    %41 = arith.divf %39, %40 : vector<16x128xf32>
    %c0_28 = arith.constant 0 : index
    %c0_29 = arith.constant 0 : index
    %42 = vector.load %arg5[%c0_28, %c0_29] : memref<16x128xf32, #tpu.memory_space<vmem>>, vector<16x128xf32>
    tpu.vector_store %arg5[%c0_28, %c0_29], %41 {strides = array<i32>} : memref<16x128xf32, #tpu.memory_space<vmem>>, vector<16x128xf32>,
    return
  }
}

</mosaic_0001>

<bundles_post_ra>
// kernel: tpu_custom_call.1
= control target key start
LH: loop header
LB: loop body
LE: loop exit
PB: predicated region body
PF: predicated region fallthrough
CT: control target
= control target key end

     0   :  { %10 = vsyncpa [#allocation3], 0  ;;  %s1567_s0 = inlined_call_operand.hbm [shape: f32[16,256], index: 0, kind: input, shape index: {}]   ;;  %s1568_s1 = inlined_call_operand.hbm [shape: bf16[3,256,256], index: 1, kind: input, shape index: {}]   ;;  %s1569_s2 = inlined_call_operand.vmem [shape: f32[3,1,256], index: 2, kind: input, shape index: {}]   ;;  %s1570_s3 = inlined_call_operand.hbm [shape: bf16[256,128], index: 3, kind: input, shape index: {}]   ;;  %s1571_s4 = inlined_call_operand.vmem [shape: f32[1,128], index: 4, kind: input, shape index: {}]   ;;  %s1572_s5 = inlined_call_operand.hbm [shape: f32[16,128], index: 5, kind: output, shape index: {}]  }
   0x1   :  { %11 = vsyncpa [#allocation6], 0 }
   0x2   :  { %12 = vsyncpa [#allocation4], 0  ;;  %s1451_s18 = smov [#allocation5]   ;;  %s1357_s22 = scalar_lea.hbm %s1568_s1, 12288 }
   0x3   :  { %s30_s19 = sshll.u32 %s1451_s18, 4  ;;  %p1358_p0 = scmp.ne.s32.totalorder %s1568_s1, %s1357_s22  ;;  %s31_s19 = int_to_ptr.vmem [resolvable:$true] %s30_s19 }
   0x4   :  { %p1361_p1 = scmp.lt.u32.totalorder %s1357_s22, %s1568_s1 }
   0x6   :  { %p1363_p2 = pnand %p1361_p1, %p1358_p0 }
   0x8   :  { %1366 = shalt.err (!%p1363_p2)
}
   0x9   :  { %s1367_s27 = scalar_lea.vmem %s31_s19, 12288  ;;  %p1372_p4 = scmp.lt.s32.totalorder %s31_s19, %s31_s19 }
   0xa   :  { %p1368_p3 = scmp.ne.s32.totalorder %s31_s19, %s1367_s27  ;;  %p1373_p5 = scmp.lt.s32.totalorder %s1367_s27, %s1367_s27 }
   0xc   :  { %p1374_p6 = por %p1373_p5, %p1372_p4 }
   0xe   :  { %p1375_p7 = pnand %p1374_p6, %p1368_p3 }
  0x10   :  { %1378 = shalt.err (!%p1375_p7)
}
  0x11   :  { %s1452_s28 = smov 128   ;;  %s1453_s29 = smov 8  }
  0x12   :  { %36 = dma.hbm_to_vmem [thread:$0]  %s1568_s1, 12288, %s31_s19, [#allocation6], %s1452_s28, %s1452_s28, %s1453_s29  }
  0x13   :  { %s1454_s7 = smov [#allocation2]   ;;  %s1379_s11 = scalar_lea.hbm %s1567_s0, 512 }
  0x14   :  { %s18_s8 = sshll.u32 %s1454_s7, 4  ;;  %p1380_p8 = scmp.ne.s32.totalorder %s1567_s0, %s1379_s11  ;;  %s19_s8 = int_to_ptr.vmem [resolvable:$true] %s18_s8 }
  0x15   :  { %p1383_p9 = scmp.lt.u32.totalorder %s1379_s11, %s1567_s0 }
  0x17   :  { %p1385_p10 = pnand %p1383_p9, %p1380_p8 }
  0x19   :  { %1388 = shalt.err (!%p1385_p10)
}
  0x1a   :  { %s1389_s16 = scalar_lea.vmem %s19_s8, 512  ;;  %p1394_p12 = scmp.lt.s32.totalorder %s19_s8, %s19_s8 }
  0x1b   :  { %p1390_p11 = scmp.ne.s32.totalorder %s19_s8, %s1389_s16  ;;  %p1395_p13 = scmp.lt.s32.totalorder %s1389_s16, %s1389_s16 }
  0x1d   :  { %p1396_p0 = por %p1395_p13, %p1394_p12 }
  0x1f   :  { %p1397_p1 = pnand %p1396_p0, %p1390_p11 }
  0x21   :  { %1400 = shalt.err (!%p1397_p1)
}
  0x22   :  { %s1455_s1 = smov 256   ;;  %s1456_s17 = smov 16  }
  0x23   :  { %24 = dma.hbm_to_vmem [thread:$0]  %s1567_s0, 512, %s19_s8, [#allocation3], %s1455_s1, %s1455_s1, %s1456_s17  }
  0x24   :  { %s1457_s20 = smov [#allocation7]   ;;  %s1401_s24 = scalar_lea.hbm %s1570_s3, 2048 }
  0x25   :  { %s44_s21 = sshll.u32 %s1457_s20, 4  ;;  %p1402_p2 = scmp.ne.s32.totalorder %s1570_s3, %s1401_s24  ;;  %s45_s21 = int_to_ptr.vmem [resolvable:$true] %s44_s21 }
  0x26   :  { %p1405_p3 = scmp.lt.u32.totalorder %s1401_s24, %s1570_s3 }
  0x28   :  { %p1407_p4 = pnand %p1405_p3, %p1402_p2 }
  0x2a   :  { %1410 = shalt.err (!%p1407_p4)
}
  0x2b   :  { %s1411_s6 = scalar_lea.vmem %s45_s21, 2048  ;;  %p1416_p6 = scmp.lt.s32.totalorder %s45_s21, %s45_s21 }
  0x2c   :  { %p1412_p5 = scmp.ne.s32.totalorder %s45_s21, %s1411_s6  ;;  %p1417_p7 = scmp.lt.s32.totalorder %s1411_s6, %s1411_s6 }
  0x2e   :  { %p1418_p8 = por %p1417_p7, %p1416_p6 }
  0x30   :  { %p1419_p9 = pnand %p1418_p8, %p1412_p5 }
  0x32   :  { %1422 = shalt.err (!%p1419_p9)
}
  0x33   :  { %s1458_s0 = smov 64   ;;  %s1459_s7 = smov 4  }
  0x34   :  { %50 = dma.hbm_to_vmem [thread:$0]  %s1570_s3, 2048, %s45_s21, [#allocation6], %s1458_s0, %s1458_s0, %s1459_s7  }
  0x35   :  { %1445 = dma.done.wait [#allocation3], 512  }
  0x36   :  { %1446 = vsyncadd [#allocation3], 4294966784 }
  0x37   :  { %1447 = dma.done.wait [#allocation6], 14336  }
  0x38   :  { %1448 = vsyncadd [#allocation6], 4294952960  ;;  %v1189_v0 = vld [vmem:[#allocation5 + $0x4] ss:$8 sps:$4 sm:$0xff]   ;;  %v1191_v1 = vld [vmem:[#allocation5] ss:$8 sps:$4 sm:$0xff]  }
  0x39   :  { %273 = vmatprep.subr.bf16.mxu0 %v1189_v0  ;;  %v1192_v2 = vld [vmem:[#allocation5 + $0x14] ss:$8 sps:$4 sm:$0xff]   ;;  %v1194_v3 = vld [vmem:[#allocation5 + $0x10] ss:$8 sps:$4 sm:$0xff]   ;;  %v1195_v4 = vld [vmem:[#allocation5 + $0x24] ss:$8 sps:$4 sm:$0xff]  }
  0x3a   :  { %274 = vmatpush1.bf16.msra.mxu0 %v1191_v1  ;;  %v1197_v5 = vld [vmem:[#allocation5 + $0x20] ss:$8 sps:$4 sm:$0xff]   ;;  %v1198_v6 = vld [vmem:[#allocation5 + $0x34] ss:$8 sps:$4 sm:$0xff]   ;;  %v1200_v7 = vld [vmem:[#allocation5 + $0x30] ss:$8 sps:$4 sm:$0xff]  }
  0x3b   :  { %275 = vmatprep.subr.bf16.mxu0 %v1192_v2  ;;  %v1201_v8 = vld [vmem:[#allocation5 + $0x44] ss:$8 sps:$4 sm:$0xff]   ;;  %v1203_v9 = vld [vmem:[#allocation5 + $0x40] ss:$8 sps:$4 sm:$0xff]   ;;  %v1204_v10 = vld [vmem:[#allocation5 + $0x54] ss:$8 sps:$4 sm:$0xff]  }
  0x3c   :  { %v1206_v11 = vld [vmem:[#allocation5 + $0x50] ss:$8 sps:$4 sm:$0xff]   ;;  %v1207_v12 = vld [vmem:[#allocation5 + $0x64] ss:$8 sps:$4 sm:$0xff]   ;;  %v1209_v15 = vld [vmem:[#allocation5 + $0x60] ss:$8 sps:$4 sm:$0xff]  }
  0x3d   :  { %v64_v13 = vld [vmem:[#allocation2 + $0x8] sm:$0xff]  ;;  %v66_v14 = vld [vmem:[#allocation2 + $0x18] sm:$0xff]  ;;  %v63_v55 = vld [vmem:[#allocation2] sm:$0xff]  ;;  %s1460_s16 = smov [#allocation8]  }
  0x3e   :  { %276 = vmatpush1.bf16.msra.mxu0 %v1194_v3  ;;  %v1210_v16 = vld [vmem:[#allocation5 + $0x74] ss:$8 sps:$4 sm:$0xff]   ;;  %v68_v17 = vpack.c.bf16 %v66_v14, %v64_v13  ;;  %v1237_v18 = vld [vmem:[#allocation5 + $0x104] ss:$8 sps:$4 sm:$0xff]   ;;  %v1239_v19 = vld [vmem:[#allocation5 + $0x100] ss:$8 sps:$4 sm:$0xff]  }
  0x3f   :  { %277 = vmatprep.subr.bf16.mxu0 %v1195_v4  ;;  %v1240_v20 = vld [vmem:[#allocation5 + $0x114] ss:$8 sps:$4 sm:$0xff]   ;;  %528 = vmatprep.subr.bf16.mxu1 %v1237_v18  ;;  %v1242_v21 = vld [vmem:[#allocation5 + $0x110] ss:$8 sps:$4 sm:$0xff]   ;;  %v1243_v23 = vld [vmem:[#allocation5 + $0x124] ss:$8 sps:$4 sm:$0xff]  }
  0x40   :  { %305 = vmatprep.mubr.bf16.mxu0 %v68_v17  ;;  %529 = vmatpush1.bf16.msra.mxu1 %v1239_v19  ;;  %v1212_v22 = vld [vmem:[#allocation5 + $0x70] ss:$8 sps:$4 sm:$0xff]   ;;  %v1213_v24 = vld [vmem:[#allocation5 + $0x84] ss:$8 sps:$4 sm:$0xff]   ;;  %v1245_v25 = vld [vmem:[#allocation5 + $0x120] ss:$8 sps:$4 sm:$0xff]  }
  0x41   :  { %530 = vmatprep.subr.bf16.mxu1 %v1240_v20  ;;  %v1215_v26 = vld [vmem:[#allocation5 + $0x80] ss:$8 sps:$4 sm:$0xff]   ;;  %v1246_v27 = vld [vmem:[#allocation5 + $0x134] ss:$8 sps:$4 sm:$0xff]   ;;  %v1248_v29 = vld [vmem:[#allocation5 + $0x130] ss:$8 sps:$4 sm:$0xff]  }
  0x42   :  { %278 = vmatpush1.bf16.msra.mxu0 %v1197_v5  ;;  %v1216_v28 = vld [vmem:[#allocation5 + $0x94] ss:$8 sps:$4 sm:$0xff]   ;;  %v1218_v30 = vld [vmem:[#allocation5 + $0x90] ss:$8 sps:$4 sm:$0xff]   ;;  %v1249_v31 = vld [vmem:[#allocation5 + $0x144] ss:$8 sps:$4 sm:$0xff]  }
  0x43   :  { %279 = vmatprep.subr.bf16.mxu0 %v1198_v6  ;;  %v1219_v32 = vld [vmem:[#allocation5 + $0xa4] ss:$8 sps:$4 sm:$0xff]   ;;  %v1221_v33 = vld [vmem:[#allocation5 + $0xa0] ss:$8 sps:$4 sm:$0xff]   ;;  %v1222_v35 = vld [vmem:[#allocation5 + $0xb4] ss:$8 sps:$4 sm:$0xff]  }
  0x44   :  { %531 = vmatpush1.bf16.msra.mxu1 %v1242_v21  ;;  %v1251_v34 = vld [vmem:[#allocation5 + $0x140] ss:$8 sps:$4 sm:$0xff]   ;;  %v1252_v36 = vld [vmem:[#allocation5 + $0x154] ss:$8 sps:$4 sm:$0xff]   ;;  %v1254_v37 = vld [vmem:[#allocation5 + $0x150] ss:$8 sps:$4 sm:$0xff]  }
  0x45   :  { %532 = vmatprep.subr.bf16.mxu1 %v1243_v23  ;;  %v1224_v38 = vld [vmem:[#allocation5 + $0xb0] ss:$8 sps:$4 sm:$0xff]   ;;  %v1255_v39 = vld [vmem:[#allocation5 + $0x164] ss:$8 sps:$4 sm:$0xff]   ;;  %v1257_v41 = vld [vmem:[#allocation5 + $0x160] ss:$8 sps:$4 sm:$0xff]  }
  0x46   :  { %280 = vmatpush1.bf16.msra.mxu0 %v1200_v7  ;;  %v1225_v40 = vld [vmem:[#allocation5 + $0xc4] ss:$8 sps:$4 sm:$0xff]   ;;  %v1227_v42 = vld [vmem:[#allocation5 + $0xc0] ss:$8 sps:$4 sm:$0xff]   ;;  %v1258_v43 = vld [vmem:[#allocation5 + $0x174] ss:$8 sps:$4 sm:$0xff]  }
  0x47   :  { %281 = vmatprep.subr.bf16.mxu0 %v1201_v8  ;;  %v1228_v44 = vld [vmem:[#allocation5 + $0xd4] ss:$8 sps:$4 sm:$0xff]   ;;  %v1260_v45 = vld [vmem:[#allocation5 + $0x170] ss:$8 sps:$4 sm:$0xff]   ;;  %v1261_v47 = vld [vmem:[#allocation5 + $0x184] ss:$8 sps:$4 sm:$0xff]  }
  0x48   :  { %533 = vmatpush1.bf16.msra.mxu1 %v1245_v25  ;;  %v1230_v46 = vld [vmem:[#allocation5 + $0xd0] ss:$8 sps:$4 sm:$0xff]   ;;  %v1231_v48 = vld [vmem:[#allocation5 + $0xe4] ss:$8 sps:$4 sm:$0xff]   ;;  %v1263_v49 = vld [vmem:[#allocation5 + $0x180] ss:$8 sps:$4 sm:$0xff]  }
  0x49   :  { %534 = vmatprep.subr.bf16.mxu1 %v1246_v27  ;;  %v1233_v50 = vld [vmem:[#allocation5 + $0xe0] ss:$8 sps:$4 sm:$0xff]   ;;  %v1264_v51 = vld [vmem:[#allocation5 + $0x194] ss:$8 sps:$4 sm:$0xff]   ;;  %v1266_v53 = vld [vmem:[#allocation5 + $0x190] ss:$8 sps:$4 sm:$0xff]  }
  0x4a   :  { %282 = vmatpush1.bf16.msra.mxu0 %v1203_v9  ;;  %v1234_v52 = vld [vmem:[#allocation5 + $0xf4] ss:$8 sps:$4 sm:$0xff]   ;;  %v1236_v54 = vld [vmem:[#allocation5 + $0xf0] ss:$8 sps:$4 sm:$0xff]   ;;  %v1267_v57 = vld [vmem:[#allocation5 + $0x1a4] ss:$8 sps:$4 sm:$0xff]  }
  0x4b   :  { %283 = vmatprep.subr.bf16.mxu0 %v1204_v10  ;;  %v65_v56 = vld [vmem:[#allocation2 + $0x10] sm:$0xff]  ;;  %v1269_v58 = vld [vmem:[#allocation5 + $0x1a0] ss:$8 sps:$4 sm:$0xff]   ;;  %v1273_v62 = vld [vmem:[#allocation5 + $0x1c4] ss:$8 sps:$4 sm:$0xff]   ;;  %s1027_s1 = sshll.u32 %s1460_s16, 4  ;;  %s1028_s1 = int_to_ptr.vmem [resolvable:$true] %s1027_s1 }
  0x4c   :  { %535 = vmatpush1.bf16.msra.mxu1 %v1248_v29  ;;  %v1270_v59 = vld [vmem:[#allocation5 + $0x1b4] ss:$8 sps:$4 sm:$0xff]   ;;  %v67_v60 = vpack.c.bf16 %v65_v56, %v63_v55  ;;  %v1272_v61 = vld [vmem:[#allocation5 + $0x1b0] ss:$8 sps:$4 sm:$0xff]   ;;  %v1275_v63 = vld [vmem:[#allocation5 + $0x1c0] ss:$8 sps:$4 sm:$0xff]   ;;  %p1428_p11 = scmp.lt.s32.totalorder %s1028_s1, %s1028_s1 }
  0x4d   :  { %536 = vmatprep.subr.bf16.mxu1 %v1249_v31  ;;  %v1276_v0 = vld [vmem:[#allocation5 + $0x1d4] ss:$8 sps:$4 sm:$0xff]   ;;  %v1278_v1 = vld [vmem:[#allocation5 + $0x1d0] ss:$8 sps:$4 sm:$0xff]   ;;  %v1279_v2 = vld [vmem:[#allocation5 + $0x1e4] ss:$8 sps:$4 sm:$0xff]  }
  0x4e   :  { %284 = vmatpush1.bf16.msra.mxu0 %v1206_v11  ;;  %v1281_v3 = vld [vmem:[#allocation5 + $0x1e0] ss:$8 sps:$4 sm:$0xff]   ;;  %v1282_v4 = vld [vmem:[#allocation5 + $0x1f4] ss:$8 sps:$4 sm:$0xff]   ;;  %v1284_v5 = vld [vmem:[#allocation5 + $0x1f0] ss:$8 sps:$4 sm:$0xff]  }
  0x4f   :  { %285 = vmatprep.subr.bf16.mxu0 %v1207_v12  ;;  %v1285_v6 = vld [vmem:[#allocation5 + $0x200] ss:$8 sps:$4 sm:$0xff]   ;;  %v1287_v7 = vld [vmem:[#allocation5 + $0x204] ss:$8 sps:$4 sm:$0xff]   ;;  %v1290_v8 = vld [vmem:[#allocation5 + $0x214] ss:$8 sps:$4 sm:$0xff]  }
  0x50   :  { %537 = vmatpush1.bf16.msra.mxu1 %v1251_v34  ;;  %v1288_v9 = vld [vmem:[#allocation5 + $0x210] ss:$8 sps:$4 sm:$0xff]   ;;  %v1293_v10 = vld [vmem:[#allocation5 + $0x224] ss:$8 sps:$4 sm:$0xff]   ;;  %v1291_v11 = vld [vmem:[#allocation5 + $0x220] ss:$8 sps:$4 sm:$0xff]   ;;  %v103_v34 = vlaneseq }
  0x51   :  { %538 = vmatprep.subr.bf16.mxu1 %v1252_v36  ;;  %v1296_v12 = vld [vmem:[#allocation5 + $0x234] ss:$8 sps:$4 sm:$0xff]   ;;  %v1294_v13 = vld [vmem:[#allocation5 + $0x230] ss:$8 sps:$4 sm:$0xff]   ;;  %v1299_v14 = vld [vmem:[#allocation5 + $0x244] ss:$8 sps:$4 sm:$0xff]  }
  0x52   :  { %286 = vmatpush1.bf16.msra.mxu0 %v1209_v15  ;;  %v1297_v15 = vld [vmem:[#allocation5 + $0x240] ss:$8 sps:$4 sm:$0xff]   ;;  %v1300_v17 = vld [vmem:[#allocation5 + $0x250] ss:$8 sps:$4 sm:$0xff]   ;;  %v1305_v18 = vld [vmem:[#allocation5 + $0x264] ss:$8 sps:$4 sm:$0xff]  }
  0x53   :  { %287 = vmatprep.subr.bf16.mxu0 %v1210_v16  ;;  %v1302_v16 = vld [vmem:[#allocation5 + $0x254] ss:$8 sps:$4 sm:$0xff]   ;;  %v1303_v19 = vld [vmem:[#allocation5 + $0x260] ss:$8 sps:$4 sm:$0xff]   ;;  %v1306_v21 = vld [vmem:[#allocation5 + $0x270] ss:$8 sps:$4 sm:$0xff]  }
  0x54   :  { %539 = vmatpush1.bf16.msra.mxu1 %v1254_v37  ;;  %v1308_v20 = vld [vmem:[#allocation5 + $0x274] ss:$8 sps:$4 sm:$0xff]   ;;  %v1309_v23 = vld [vmem:[#allocation5 + $0x280] ss:$8 sps:$4 sm:$0xff]   ;;  %v1312_v25 = vld [vmem:[#allocation5 + $0x290] ss:$8 sps:$4 sm:$0xff]  }
  0x55   :  { %540 = vmatprep.subr.bf16.mxu1 %v1255_v39  ;;  %v1315_v27 = vld [vmem:[#allocation5 + $0x2a0] ss:$8 sps:$4 sm:$0xff]   ;;  %v1318_v29 = vld [vmem:[#allocation5 + $0x2b0] ss:$8 sps:$4 sm:$0xff]   ;;  %v1329_v55 = vld [vmem:[#allocation5 + $0x2e4] ss:$8 sps:$4 sm:$0xff]  }
  0x56   :  { %288 = vmatpush1.bf16.msra.mxu0 %v1212_v22  ;;  %v1311_v22 = vld [vmem:[#allocation5 + $0x284] ss:$8 sps:$4 sm:$0xff]   ;;  %v1321_v31 = vld [vmem:[#allocation5 + $0x2c0] ss:$8 sps:$4 sm:$0xff]  }
  0x57   :  { %289 = vmatprep.subr.bf16.mxu0 %v1213_v24  ;;  %v1314_v24 = vld [vmem:[#allocation5 + $0x294] ss:$8 sps:$4 sm:$0xff]   ;;  %v101_v37 = vld [vmem:[%s1569_s2] sm:$0x3] }
  0x58   :  { %541 = vmatpush1.bf16.msra.mxu1 %v1257_v41  ;;  %v1327_v56 = vld [vmem:[#allocation5 + $0x2e0] ss:$8 sps:$4 sm:$0xff]  }
  0x59   :  { %542 = vmatprep.subr.bf16.mxu1 %v1258_v43 }
  0x5a   :  { %290 = vmatpush1.bf16.msra.mxu0 %v1215_v26  ;;  %v1317_v26 = vld [vmem:[#allocation5 + $0x2a4] ss:$8 sps:$4 sm:$0xff]  }
  0x5b   :  { %291 = vmatprep.subr.bf16.mxu0 %v1216_v28  ;;  %v1320_v28 = vld [vmem:[#allocation5 + $0x2b4] ss:$8 sps:$4 sm:$0xff]  }
  0x5c   :  { %543 = vmatpush1.bf16.msra.mxu1 %v1260_v45 }
  0x5d   :  { %544 = vmatprep.subr.bf16.mxu1 %v1261_v47 }
  0x5e   :  { %292 = vmatpush1.bf16.msra.mxu0 %v1218_v30  ;;  %v1323_v30 = vld [vmem:[#allocation5 + $0x2c4] ss:$8 sps:$4 sm:$0xff]  }
  0x5f   :  { %293 = vmatprep.subr.bf16.mxu0 %v1219_v32  ;;  %v1326_v32 = vld [vmem:[#allocation5 + $0x2d4] ss:$8 sps:$4 sm:$0xff]  }
  0x60   :  { %545 = vmatpush1.bf16.msra.mxu1 %v1263_v49 }
  0x61   :  { %546 = vmatprep.subr.bf16.mxu1 %v1264_v51 }
  0x62   :  { %294 = vmatpush1.bf16.msra.mxu0 %v1221_v33  ;;  %v1324_v33 = vld [vmem:[#allocation5 + $0x2d0] ss:$8 sps:$4 sm:$0xff]  }
  0x63   :  { %295 = vmatprep.subr.bf16.mxu0 %v1222_v35  ;;  %v104_v35 = vshrl.u32 %v103_v34, 7 }
  0x64   :  { %547 = vmatpush1.bf16.msra.mxu1 %v1266_v53 }
  0x65   :  { %548 = vmatprep.subr.bf16.mxu1 %v1267_v57  ;;  %v1530_v36 = vsub.s32 0, %v104_v35  ;;  %v1332_v57 = vld [vmem:[#allocation5 + $0x2f4] ss:$8 sps:$4 sm:$0xff]  }
  0x66   :  { %296 = vmatpush1.bf16.msra.mxu0 %v1224_v38  ;;  %v1535_v38 = vsub.s32 1, %v104_v35 }
  0x67   :  { %297 = vmatprep.subr.bf16.mxu0 %v1225_v40  ;;  %v106_v39 = vrot.slane %v101_v37, %v1530_v36 }
  0x68   :  { %549 = vmatpush1.bf16.msra.mxu1 %v1269_v58  ;;  %v110_v40 = vrot.slane %v101_v37, %v1535_v38  ;;  %v1330_v58 = vld [vmem:[#allocation5 + $0x2f0] ss:$8 sps:$4 sm:$0xff]  }
  0x69   :  { %550 = vmatprep.subr.bf16.mxu1 %v1270_v59  ;;  %v1333_v59 = vld [vmem:[#allocation7 + $0x40] sm:$0xff]  }
  0x6a   :  { %298 = vmatpush1.bf16.msra.mxu0 %v1227_v42 }
  0x6b   :  { %299 = vmatprep.subr.bf16.mxu0 %v1228_v44 }
  0x6c   :  { %551 = vmatpush1.bf16.msra.mxu1 %v1272_v61  ;;  %v1335_v61 = vld [vmem:[#allocation7 + $0x48] sm:$0xff]  }
  0x6d   :  { %552 = vmatprep.subr.bf16.mxu1 %v1273_v62  ;;  %v1336_v62 = vld [vmem:[#allocation7 + $0x8] sm:$0xff]  }
  0x6e   :  { %300 = vmatpush1.bf16.msra.mxu0 %v1230_v46 }
  0x6f   :  { %301 = vmatprep.subr.bf16.mxu0 %v1231_v48 }
  0x70   :  { %553 = vmatpush1.bf16.msra.mxu1 %v1275_v63  ;;  %v1337_v63 = vld [vmem:[#allocation7 + $0x50] sm:$0xff]  }
  0x71   :  { %554 = vmatprep.subr.bf16.mxu1 %v1276_v0  ;;  %v1338_v0 = vld [vmem:[#allocation7 + $0x10] sm:$0xff]  }
  0x72   :  { %302 = vmatpush1.bf16.msra.mxu0 %v1233_v50 }
  0x73   :  { %303 = vmatprep.subr.bf16.mxu0 %v1234_v52 }
  0x74   :  { %555 = vmatpush1.bf16.msra.mxu1 %v1278_v1  ;;  %v1339_v1 = vld [vmem:[#allocation7 + $0x58] sm:$0xff]  }
  0x75   :  { %556 = vmatprep.subr.bf16.mxu1 %v1279_v2  ;;  %v1340_v2 = vld [vmem:[#allocation7 + $0x18] sm:$0xff]  }
  0x76   :  { %304 = vmatpush1.bf16.msra.mxu0 %v1236_v54 }
  0x77   :  { %783 = vmatprep.subr.bf16.mxu0 %v1287_v7 }
  0x78   :  { %557 = vmatpush1.bf16.msra.mxu1 %v1281_v3  ;;  %v1341_v3 = vld [vmem:[#allocation7 + $0x60] sm:$0xff]  }
  0x79   :  { %306 = vmatmul.mubr.bf16.vlgmr.msra.gmra.mrb[0].mxu0 %v67_v60  ;;  %558 = vmatprep.subr.bf16.mxu1 %v1282_v4  ;;  %v1334_v60 = vld [vmem:[#allocation7] sm:$0xff]  }
  0x7a   :  { %784 = vmatpush1.bf16.msra.mxu0 %v1285_v6  ;;  %v1342_v4 = vld [vmem:[#allocation7 + $0x20] sm:$0xff]  }
  0x7b   :  { %785 = vmatprep.subr.bf16.mxu0 %v1290_v8  ;;  %v1072_v6 = vld [vmem:[%s1569_s2 + $0x2] sm:$0x3] }
  0x7c   :  { %559 = vmatpush1.bf16.msra.mxu1 %v1284_v5  ;;  %v1343_v5 = vld [vmem:[#allocation7 + $0x68] sm:$0xff]   ;;  %v361_v7 = vrot.slane %v1072_v6, %v1530_v36  ;;  %v365_v8 = vrot.slane %v1072_v6, %v1535_v38 }
  0x7d   :  { %1157 = vmatprep.subr.bf16.mxu1 %v1333_v59 }
  0x7e   :  { %786 = vmatpush1.bf16.msra.mxu0 %v1288_v9 }
  0x7f   :  { %787 = vmatprep.subr.bf16.mxu0 %v1293_v10 }
  0x82   :  { %788 = vmatpush1.bf16.msra.mxu0 %v1291_v11 }
  0x83   :  { %789 = vmatprep.subr.bf16.mxu0 %v1296_v12 }
  0x86   :  { %790 = vmatpush1.bf16.msra.mxu0 %v1294_v13 }
  0x87   :  { %791 = vmatprep.subr.bf16.mxu0 %v1299_v14 }
  0x8a   :  { %792 = vmatpush1.bf16.msra.mxu0 %v1297_v15 }
  0x8b   :  { %793 = vmatprep.subr.bf16.mxu0 %v1302_v16 }
  0x8e   :  { %794 = vmatpush1.bf16.msra.mxu0 %v1300_v17 }
  0x8f   :  { %795 = vmatprep.subr.bf16.mxu0 %v1305_v18 }
  0x92   :  { %796 = vmatpush1.bf16.msra.mxu0 %v1303_v19 }
  0x93   :  { %797 = vmatprep.subr.bf16.mxu0 %v1308_v20 }
  0x96   :  { %798 = vmatpush1.bf16.msra.mxu0 %v1306_v21 }
  0x97   :  { %799 = vmatprep.subr.bf16.mxu0 %v1311_v22 }
  0x9a   :  { %800 = vmatpush1.bf16.msra.mxu0 %v1309_v23  ;;  %v1344_v23 = vld [vmem:[#allocation7 + $0x28] sm:$0xff]  }
  0x9b   :  { %801 = vmatprep.subr.bf16.mxu0 %v1314_v24  ;;  %v1345_v24 = vld [vmem:[#allocation7 + $0x70] sm:$0xff]  }
  0x9e   :  { %802 = vmatpush1.bf16.msra.mxu0 %v1312_v25  ;;  %v1346_v25 = vld [vmem:[#allocation7 + $0x30] sm:$0xff]  }
  0x9f   :  { %803 = vmatprep.subr.bf16.mxu0 %v1317_v26  ;;  %v1347_v26 = vld [vmem:[#allocation7 + $0x78] sm:$0xff]  }
  0xa2   :  { %804 = vmatpush1.bf16.msra.mxu0 %v1315_v27  ;;  %v1348_v27 = vld [vmem:[#allocation7 + $0x38] sm:$0xff]  }
  0xa3   :  { %805 = vmatprep.subr.bf16.mxu0 %v1320_v28  ;;  %v1105_v28 = vld [vmem:[%s1569_s2 + $0x4] sm:$0x3] }
  0xa6   :  { %806 = vmatpush1.bf16.msra.mxu0 %v1318_v29  ;;  %v616_v29 = vrot.slane %v1105_v28, %v1530_v36  ;;  %v1138_v36 = vld [vmem:[%s1571_s4] ss:$0 sm:$0xff]  ;;  %s1423_s4 = scalar_lea.vmem %s1028_s1, 256 }
  0xa7   :  { %807 = vmatprep.subr.bf16.mxu0 %v1323_v30  ;;  %v620_v30 = vrot.slane %v1105_v28, %v1535_v38  ;;  %p1424_p10 = scmp.ne.s32.totalorder %s1028_s1, %s1423_s4  ;;  %p1429_p12 = scmp.lt.s32.totalorder %s1423_s4, %s1423_s4 }
  0xa9   :  { %p1430_p13 = por %p1429_p12, %p1428_p11 }
  0xaa   :  { %808 = vmatpush1.bf16.msra.mxu0 %v1321_v31 }
  0xab   :  { %809 = vmatprep.subr.bf16.mxu0 %v1326_v32  ;;  %p1431_p0 = pnand %p1430_p13, %p1424_p10 }
  0xae   :  { %810 = vmatpush1.bf16.msra.mxu0 %v1324_v33 }
  0xaf   :  { %811 = vmatprep.subr.bf16.mxu0 %v1329_v55 }
  0xb2   :  { %812 = vmatpush1.bf16.msra.mxu0 %v1327_v56 }
  0xb3   :  { %813 = vmatprep.subr.bf16.mxu0 %v1332_v57 }
  0xb6   :  { %814 = vmatpush1.bf16.msra.mxu0 %v1330_v58 }
 0x14c   :  { %v307_v41 = vpop.f32.mrb[0].mxu0 }
 0x14d   :  { %v308_v42 = vadd.f32 %v307_v41, %v106_v39  ;;  %v309_v43 = vpop.f32.mrb[1].mxu0 }
 0x14e   :  { %v310_v44 = vadd.f32 %v309_v43, %v110_v40  ;;  %v311_v45 = vpop.f32.mrb[2].mxu0 }
 0x14f   :  { %v312_v46 = vadd.f32 %v311_v45, %v106_v39  ;;  %v313_v47 = vpop.f32.mrb[3].mxu0  ;;  %v316_v49 = vmax.f32 %v308_v42, 0.0 }
 0x150   :  { %v314_v48 = vadd.f32 %v313_v47, %v110_v40  ;;  %v317_v51 = vmax.f32 %v310_v44, 0.0 }
 0x151   :  { %v318_v50 = vmax.f32 %v312_v46, 0.0 }
 0x152   :  { %v319_v52 = vmax.f32 %v314_v48, 0.0 }
 0x153   :  { %v320_v53 = vpack.c.bf16 %v318_v50, %v316_v49 }
 0x154   :  { %v321_v54 = vpack.c.bf16 %v319_v52, %v317_v51 }
 0x156   :  { %560 = vmatprep.mubr.bf16.mxu1 %v321_v54 }
 0x157   :  { %561 = vmatmul.mubr.bf16.vlgmr.msra.gmra.mrb[0].mxu1 %v320_v53 }
 0x158   :  { %1158 = vmatpush3.bf16.msra.mxu1 %v1334_v60 }
 0x159   :  { %1159 = vmatprep.subr.bf16.mxu1 %v1335_v61 }
 0x15c   :  { %1160 = vmatpush3.bf16.msra.mxu1 %v1336_v62 }
 0x15d   :  { %1161 = vmatprep.subr.bf16.mxu1 %v1337_v63 }
 0x160   :  { %1162 = vmatpush3.bf16.msra.mxu1 %v1338_v0 }
 0x161   :  { %1163 = vmatprep.subr.bf16.mxu1 %v1339_v1 }
 0x164   :  { %1164 = vmatpush3.bf16.msra.mxu1 %v1340_v2 }
 0x165   :  { %1165 = vmatprep.subr.bf16.mxu1 %v1341_v3 }
 0x168   :  { %1166 = vmatpush3.bf16.msra.mxu1 %v1342_v4 }
 0x169   :  { %1167 = vmatprep.subr.bf16.mxu1 %v1343_v5 }
 0x16c   :  { %1168 = vmatpush3.bf16.msra.mxu1 %v1344_v23 }
 0x16d   :  { %1169 = vmatprep.subr.bf16.mxu1 %v1345_v24 }
 0x170   :  { %1170 = vmatpush3.bf16.msra.mxu1 %v1346_v25 }
 0x171   :  { %1171 = vmatprep.subr.bf16.mxu1 %v1347_v26 }
 0x174   :  { %1172 = vmatpush3.bf16.msra.mxu1 %v1348_v27 }
 0x22a   :  { %v562_v9 = vpop.f32.mrb[0].mxu1 }
 0x22b   :  { %v563_v10 = vadd.f32 %v562_v9, %v361_v7  ;;  %v564_v11 = vpop.f32.mrb[1].mxu1 }
 0x22c   :  { %v565_v12 = vadd.f32 %v564_v11, %v365_v8  ;;  %v566_v13 = vpop.f32.mrb[2].mxu1 }
 0x22d   :  { %v567_v14 = vadd.f32 %v566_v13, %v361_v7  ;;  %v568_v15 = vpop.f32.mrb[3].mxu1  ;;  %v571_v17 = vmax.f32 %v563_v10, 0.0 }
 0x22e   :  { %v569_v16 = vadd.f32 %v568_v15, %v365_v8  ;;  %v572_v19 = vmax.f32 %v565_v12, 0.0 }
 0x22f   :  { %v573_v18 = vmax.f32 %v567_v14, 0.0 }
 0x230   :  { %v574_v20 = vmax.f32 %v569_v16, 0.0 }
 0x231   :  { %v575_v21 = vpack.c.bf16 %v573_v18, %v571_v17 }
 0x232   :  { %v576_v22 = vpack.c.bf16 %v574_v20, %v572_v19 }
 0x234   :  { %815 = vmatprep.mubr.bf16.mxu0 %v576_v22 }
 0x235   :  { %816 = vmatmul.mubr.bf16.vlgmr.msra.gmra.mrb[4].mxu0 %v575_v21 }
 0x308   :  { %v817_v31 = vpop.f32.mrb[4].mxu0 }
 0x309   :  { %v818_v32 = vadd.f32 %v817_v31, %v616_v29  ;;  %v819_v33 = vpop.f32.mrb[5].mxu0 }
 0x30a   :  { %v820_v34 = vadd.f32 %v819_v33, %v620_v30  ;;  %v821_v35 = vpop.f32.mrb[6].mxu0 }
 0x30b   :  { %v822_v37 = vadd.f32 %v821_v35, %v616_v29  ;;  %v823_v39 = vpop.f32.mrb[7].mxu0  ;;  %v826_v41 = vmax.f32 %v818_v32, 0.0 }
 0x30c   :  { %v824_v40 = vadd.f32 %v823_v39, %v620_v30  ;;  %v827_v43 = vmax.f32 %v820_v34, 0.0 }
 0x30d   :  { %v828_v42 = vmax.f32 %v822_v37, 0.0 }
 0x30e   :  { %v829_v44 = vmax.f32 %v824_v40, 0.0 }
 0x30f   :  { %v830_v45 = vpack.c.bf16 %v828_v42, %v826_v41 }
 0x310   :  { %v831_v46 = vpack.c.bf16 %v829_v44, %v827_v43 }
 0x312   :  { %999 = vmatprep.mubr.bf16.mxu1 %v831_v46 }
 0x313   :  { %1000 = vmatmul.mubr.bf16.vlgmr.msra.gmra.mrb[4].mxu1 %v830_v45 }
 0x3e6   :  { %v1173_v47 = vpop.f32.mrb[4].mxu1 }
 0x3e7   :  { %v1174_v38 = vpop.f32.mrb[5].mxu1 }
 0x3e8   :  { %v1175_v48 = vadd.f32 %v1174_v38, %v1173_v47  ;;  %v1176_v49 = vpop.f32.mrb[6].mxu1 }
 0x3e9   :  { %v1177_v50 = vpop.f32.mrb[7].mxu1 }
 0x3ea   :  { %v1002_v51 = vadd.f32 %v1175_v48, %v1138_v36  ;;  %v1178_v52 = vadd.f32 %v1177_v50, %v1176_v49 }
 0x3ec   :  { %v1155_v53 = vmul.f32 -1.442695, %v1002_v51  ;;  %v1005_v54 = vadd.f32 %v1178_v52, %v1138_v36 }
 0x3ee   :  { %1349 = vpow2.f32 %v1155_v53  ;;  %v1156_v55 = vmul.f32 -1.442695, %v1005_v54 }
 0x3f0   :  { %1351 = vpow2.f32 %v1156_v55 }
 0x3f8   :  { %v1350_v56 = vpop.eup %1349 }
 0x3f9   :  { %v1014_v57 = vadd.f32 1.0, %v1350_v56 }
 0x3fa   :  { %v1352_v58 = vpop.eup %1351 }
 0x3fb   :  { %1353 = vrcp.f32 %v1014_v57  ;;  %v1015_v59 = vadd.f32 1.0, %v1352_v58 }
 0x3fd   :  { %1355 = vrcp.f32 %v1015_v59 }
 0x405   :  { %v1354_v60 = vpop.eup %1353 }
 0x406   :  { %1020 = vst [vmem:[#allocation8] sm:$0xff] %v1354_v60 }
 0x407   :  { %v1356_v61 = vpop.eup %1355 }
 0x408   :  { %1021 = vst [vmem:[#allocation8 + $0x8] sm:$0xff] %v1356_v61 }
 0x409   :  { %1434 = shalt.err (!%p1431_p0)
}
 0x40a   :  { %s1435_s19 = scalar_lea.hbm %s1572_s5, 256 }
 0x40b   :  { %p1436_p1 = scmp.ne.s32.totalorder %s1572_s5, %s1435_s19  ;;  %p1439_p2 = scmp.lt.u32.totalorder %s1435_s19, %s1572_s5 }
 0x40d   :  { %p1441_p3 = pnand %p1439_p2, %p1436_p1 }
 0x40f   :  { %1444 = shalt.err (!%p1441_p3)
}
 0x410   :  { %1033 = dma.vmem_to_hbm [thread:$0]  %s1028_s1, 256, %s1572_s5, [#allocation4], %s1452_s28, %s1452_s28, %s1453_s29  }
 0x411   :  { %1449 = dma.done.wait [#allocation4], 256  }
 0x412   :  { %1450 = vsyncadd [#allocation4], 4294967040 }
 0x413   :  { %1037 = vsyncpa [#allocation3], 1 }
 0x414   :  { %1038 = vsyncpa [#allocation6], 1 }
 0x415   :  { %1039 = vsyncpa [#allocation4], 1 }

</bundles_post_ra>
